<compile_context>
chip_gen: v6e
topology: v6e:2x2x1
jax: 0.10.0
libtpu: 0.0.40
codegen_flags: <defaults>
</compile_context>

<pallas_src>
import functools

import jax
import jax.numpy as jnp
from jax import lax
from jax.experimental import pallas as pl
from jax.experimental.pallas import tpu as pltpu


def _round_up(x, m):
    return ((x + m - 1) // m) * m


# ---------------------------------------------------------------------------
# Chip-generation aware tuning knobs
# ---------------------------------------------------------------------------
_CHIP_PARAMS = {
    # k_pad_multiple : reduction-dim alignment (v5e MXU is 128-wide)
    # base_tn        : largest token tile considered
    # num_tc         : TensorCores per chip (v7x megacore)
    # scoped_default : default scoped-VMEM budget we must not silently exceed
    # vmem_cap       : largest vmem_limit_bytes we are willing to request
    "v5e": dict(k_pad_multiple=128, base_tn=256, num_tc=1,
                scoped_default=16 << 20, vmem_cap=64 << 20),
    "v6e": dict(k_pad_multiple=256, base_tn=512, num_tc=1,
                scoped_default=32 << 20, vmem_cap=64 << 20),
    "v7x": dict(k_pad_multiple=256, base_tn=256, num_tc=2,
                scoped_default=32 << 20, vmem_cap=48 << 20),
    "unknown": dict(k_pad_multiple=256, base_tn=256, num_tc=1,
                    scoped_default=16 << 20, vmem_cap=48 << 20),
}


def _chip_generation():
    try:
        kind = jax.devices()[0].device_kind.lower()
    except Exception:
        return "unknown"
    if "v5 lite" in kind or "v5e" in kind or "v5litepod" in kind:
        return "v5e"
    if "v6" in kind or "trillium" in kind:
        return "v6e"
    if "v7" in kind or "7x" in kind or "ironwood" in kind:
        return "v7x"
    return "unknown"


# ---------------------------------------------------------------------------
# Deterministic "parameter" construction (matches torch _init_position_vector)
# ---------------------------------------------------------------------------
def build_position_tables(num_pos_feats, temperature, max_pos):
    x_steps = y_steps = num_pos_feats // 3
    z_steps = num_pos_feats - x_steps - y_steps
    for s in (x_steps, y_steps, z_steps):
        # sin/cos interleave stacks equal-length halves -> steps must be even
        assert s % 2 == 0, "each per-axis step count must be even"
    xyz_embed = jnp.arange(max_pos, dtype=jnp.float32)[:, None]          # (max_pos, 1)

    def make(steps):
        dim_t = jnp.arange(steps, dtype=jnp.float32)
        dim_t = temperature ** (2.0 * jnp.floor(dim_t / 2.0) / steps)     # torch: dim_t // 2
        pos = xyz_embed / dim_t                                           # (max_pos, steps)
        interleaved = jnp.stack(
            [jnp.sin(pos[:, 0::2]), jnp.cos(pos[:, 1::2])], axis=2
        ).reshape(max_pos, -1)
        return interleaved.astype(jnp.float32)

    return make(x_steps), make(y_steps), make(z_steps)


def build_combined_table(num_pos_feats, temperature, max_pos, *,
                         k_pad_multiple=256, f_pad_multiple=128,
                         dtype=jnp.float32):
    """Block-diagonal [K_pad, F_pad] table for the fused one-hot gather.

    K padded to the MXU reduction alignment, F padded to a multiple of 128 so
    the kernel's output store is lane-dense.  Padding rows/columns are zero.
    """
    tx, ty, tz = build_position_tables(num_pos_feats, temperature, max_pos)
    sx, sy = tx.shape[1], ty.shape[1]
    k = 3 * max_pos
    k_pad = _round_up(k, k_pad_multiple)
    f_pad = _round_up(num_pos_feats, f_pad_multiple)
    table = jnp.zeros((k_pad, f_pad), dtype=jnp.float32)
    table = table.at[0:max_pos, 0:sx].set(tx)
    table = table.at[max_pos:2 * max_pos, sx:sx + sy].set(ty)
    table = table.at[2 * max_pos:3 * max_pos, sx + sy:num_pos_feats].set(tz)
    return table.astype(dtype), (tx, ty, tz)


# ---------------------------------------------------------------------------
# Pallas kernel: one fused one-hot @ block-diagonal-table matmul per block
# ---------------------------------------------------------------------------
def spe_kernel(coords_ref, table_ref, out_ref, *, origin_pos, max_pos):
    coords = coords_ref[...]                                              # (TN, 4) f32
    # (coords[:, 1:4] + origin).long() -> truncate toward zero, then clamp.
    idx = (coords[:, 1:4] + jnp.float32(origin_pos)).astype(jnp.int32)    # (TN, 3)
    idx = jnp.clip(idx, 0, max_pos - 1)

    tn = coords.shape[0]
    k_pad = table_ref.shape[0]
    lane = lax.broadcasted_iota(jnp.int32, (tn, k_pad), 1)                # (TN, K_pad)

    # Combined one-hot over the 3 concatenated index bands (x | y | z).
    # Cast to the table dtype so a bf16 table gets a bf16 x bf16 MXU pass.
    onehot = ((lane == idx[:, 0:1])
              | (lane == idx[:, 1:2] + max_pos)
              | (lane == idx[:, 2:3] + 2 * max_pos)).astype(table_ref.dtype)

    # Single MXU pass; output written as one lane-dense slab (no concat).
    out_ref[...] = jnp.dot(onehot, table_ref[...],
                           preferred_element_type=jnp.float32
                           ).astype(out_ref.dtype)


# ---------------------------------------------------------------------------
# Host-side tile selection / VMEM accounting
# ---------------------------------------------------------------------------
def _choose_tile(n, base_tn, num_tc):
    # Small N: single-TC chips keep ONE grid step (extra steps only add the
    # ~0.35us per-step overhead); v7x splits into 2 for megacore sharding.
    if n <= 128:
        if num_tc >= 2 and n >= 16:
            return max(8, _round_up((n + 1) // 2, 8))
        return max(8, _round_up(n, 8))
    # Larger N: pick the tile (<= base_tn) minimizing padded-row waste,
    # subject to >= num_tc grid steps; prefer the bigger tile on ties.
    best = None
    for t in (128, 256, 512, 1024):
        if t > base_tn:
            continue
        n_pad = _round_up(n, t)
        if n_pad // t < num_tc:
            continue
        key = (n_pad - n, -t)
        if best is None or key < best[0]:
            best = (key, t)
    return best[1] if best is not None else min(128, base_tn)


def _vmem_need_bytes(tn, k_pad, f_pad, table_itemsize):
    coords = 2 * tn * 128 * 4            # (tn,4) block lane-pads to 128 lanes, 2 bufs
    table = k_pad * f_pad * table_itemsize   # single-buffered (Buffered(1))
    out = 2 * tn * f_pad * 4             # double-buffered output blocks
    onehot = tn * k_pad * 4              # materialized one-hot temporary
    iota = tn * k_pad * 4                # materialized iota temporary
    return coords + table + out + onehot + iota + (2 << 20)   # + headroom


# ---------------------------------------------------------------------------
# Wrapper
# ---------------------------------------------------------------------------
def sparse_positional_encoding(coords, table, *, origin_pos, max_pos,
                               num_pos_feats=None, chip=None, tn=None):
    """coords: (N,4) f32.  table: (K_pad, F_pad) combined table.  -> (N, F) f32."""
    n = coords.shape[0]
    k_pad, f_pad = table.shape
    f = f_pad if num_pos_feats is None else num_pos_feats
    params = _CHIP_PARAMS.get(chip or _chip_generation(), _CHIP_PARAMS["unknown"])
    table_itemsize = jnp.dtype(table.dtype).itemsize

    if tn is None:
        tn = _choose_tile(n, params["base_tn"], params["num_tc"])
    # Shrink the tile until the corrected working-set estimate fits the cap.
    while tn > 128 and _vmem_need_bytes(tn, k_pad, f_pad, table_itemsize) > params["vmem_cap"]:
        tn //= 2
    vmem_need = _vmem_need_bytes(tn, k_pad, f_pad, table_itemsize)

    # Ragged N: pad to a multiple of tn (padded rows produce garbage that is
    # sliced away below; their indices still clamp into range so no OOB).
    n_pad = _round_up(max(n, tn), tn)
    if n_pad != n:
        coords = jnp.pad(coords, ((0, n_pad - n), (0, 0)))

    cost = pl.CostEstimate(
        flops=2 * n_pad * k_pad * f_pad,
        transcendentals=0,
        bytes_accessed=(n_pad * 4 * 4
                        + k_pad * f_pad * table_itemsize
                        + n_pad * f_pad * 4),
    )

    cp_kwargs = dict(dimension_semantics=("parallel",))
    if vmem_need > params["scoped_default"]:
        # Raise the scoped VMEM limit only when needed; generation-aware cap
        # (48 MiB on v7x's 64 MiB part, 64 MiB on the 128 MiB parts).
        cp_kwargs["vmem_limit_bytes"] = int(
            min(max(vmem_need * 5 // 4, params["scoped_default"]),
                params["vmem_cap"]))

    kernel = functools.partial(spe_kernel, origin_pos=origin_pos, max_pos=max_pos)

    def _run(table_spec):
        return pl.pallas_call(
            kernel,
            out_shape=jax.ShapeDtypeStruct((n_pad, f_pad), jnp.float32),
            grid_spec=pltpu.PrefetchScalarGridSpec(
                num_scalar_prefetch=0,
                grid=(n_pad // tn,),
                in_specs=[
                    pl.BlockSpec((tn, 4), lambda i: (i, 0)),      # coords block
                    table_spec,                                   # resident table
                ],
                out_specs=pl.BlockSpec((tn, f_pad), lambda i: (i, 0)),
            ),
            compiler_params=pltpu.CompilerParams(**cp_kwargs),
            cost_estimate=cost,
        )(coords, table)

    try:
        # Constant index_map -> single-buffer the table (halves its VMEM cost).
        out = _run(pl.BlockSpec((k_pad, f_pad), lambda i: (0, 0),
                                pipeline_mode=pl.Buffered(1)))
    except Exception:
        # Fallback for jax builds that reject pipeline_mode / Buffered(1).
        out = _run(pl.BlockSpec((k_pad, f_pad), lambda i: (0, 0)))

    return out[:n, :f]


# Pure-JAX reference for correctness checking (exact gather).
def ref_forward(coords, tx, ty, tz, origin_pos, max_pos):
    idx = jnp.clip((coords[:, 1:4] + origin_pos).astype(jnp.int32), 0, max_pos - 1)
    return jnp.concatenate(
        [tx[idx[:, 0]], ty[idx[:, 1]], tz[idx[:, 2]]], axis=1)


if __name__ == "__main__":
    # Small, deterministic configuration.
    num_pos_feats = 24          # -> x/y/z steps = 8/8/8 (even, like 512 -> 170/170/172)
    temperature = 10000
    max_pos = 64
    origin_pos = max_pos // 2

    chip = _chip_generation()
    kpm = _CHIP_PARAMS[chip]["k_pad_multiple"]

    table_f32, (tx, ty, tz) = build_combined_table(
        num_pos_feats, temperature, max_pos, k_pad_multiple=kpm)
    table_bf16 = table_f32.astype(jnp.bfloat16)   # optional MXU-native path

    key = jax.random.PRNGKey(0)
    k1, k2, k3 = jax.random.split(key, 3)

    def make_coords(k, n_pts, batch_id):
        # integer voxel coords in [-max_pos/2, max_pos/2), stored as float32
        xyz = jax.random.randint(k, (n_pts, 3), -max_pos // 2, max_pos // 2)
        b = jnp.full((n_pts, 1), batch_id, dtype=jnp.int32)
        return jnp.concatenate([b, xyz], axis=1).astype(jnp.float32)

    # Two small per-batch coord sets (module's list interface) + one larger
    # ragged set to exercise the tile-selection + padding path.
    coords_list = [make_coords(k1, 16, 0), make_coords(k2, 8, 1),
                   make_coords(k3, 300, 0)]

    pos_list = []
    for coords in coords_list:
        pos = sparse_positional_encoding(
            coords, table_f32, origin_pos=origin_pos, max_pos=max_pos,
            num_pos_feats=num_pos_feats, chip=chip)
        pos = jax.block_until_ready(pos)
        ref = ref_forward(coords, tx, ty, tz, origin_pos, max_pos)
        assert pos.shape == (coords.shape[0], num_pos_feats)
        assert jnp.allclose(pos, ref, atol=1e-5, rtol=1e-5)
        pos_list.append(pos)

    # bf16-table path (precision/perf trade-off flag) — looser tolerance.
    pos_bf16 = sparse_positional_encoding(
        coords_list[2], table_bf16, origin_pos=origin_pos, max_pos=max_pos,
        num_pos_feats=num_pos_feats, chip=chip)
    pos_bf16 = jax.block_until_ready(pos_bf16)
    ref = ref_forward(coords_list[2], tx, ty, tz, origin_pos, max_pos)
    assert jnp.allclose(pos_bf16, ref, atol=3e-2, rtol=3e-2)

    print("KERNEL_OK")
</pallas_src>

<mosaic_0001>
module attributes {stable_mosaic.version = 11 : i64} {
  func.func @spe_kernel(%arg0: i32, %arg1: memref<16x4xf32, #tpu.memory_space<vmem>>, %arg2: memref<256x128xf32, #tpu.memory_space<vmem>>, %arg3: memref<16x128xf32, #tpu.memory_space<vmem>>) attributes {dimension_semantics = [#tpu.dimension_semantics<parallel>], iteration_bounds = array<i64: 1>, scalar_prefetch = 0 : i64, scratch_operands = 0 : i64, tpu.core_type = #tpu.core_type<tc>, window_params = [{transform_indices = @transform_0, window_bounds = array<i64: 16, 4>}, {pipeline_mode = #tpu.pipeline_mode<synchronous>, transform_indices = @transform_1, window_bounds = array<i64: 256, 128>}, {transform_indices = @transform_2, window_bounds = array<i64: 16, 128>}]} {
    %c0 = arith.constant 0 : index
    %c0_0 = arith.constant 0 : index
    %0 = vector.load %arg1[%c0, %c0_0] : memref<16x4xf32, #tpu.memory_space<vmem>>, vector<16x4xf32>
    %1 = vector.extract_strided_slice %0 {offsets = [0, 1], sizes = [16, 3], strides = [1, 1]} : vector<16x4xf32> to vector<16x3xf32>
    %cst = arith.constant 3.200000e+01 : f32
    %2 = vector.broadcast %cst : f32 to vector<16x3xf32>
    %3 = arith.addf %1, %2 : vector<16x3xf32>
    %4 = arith.fptosi %3 : vector<16x3xf32> to vector<16x3xi32>
    %c0_i32 = arith.constant 0 : i32
    %c63_i32 = arith.constant 63 : i32
    %5 = vector.broadcast %c0_i32 : i32 to vector<16x3xi32>
    %6 = arith.maxsi %5, %4 : vector<16x3xi32>
    %7 = vector.broadcast %c63_i32 : i32 to vector<16x3xi32>
    %8 = arith.minsi %7, %6 : vector<16x3xi32>
    %9 = tpu.iota {dimensions = array<i32: 1>} : vector<16x256xi32>
    %10 = vector.extract_strided_slice %8 {offsets = [0, 0], sizes = [16, 1], strides = [1, 1]} : vector<16x3xi32> to vector<16x1xi32>
    %11 = vector.broadcast %10 : vector<16x1xi32> to vector<16x256xi32>
    %12 = arith.cmpi eq, %9, %11 : vector<16x256xi32>
    %13 = vector.extract_strided_slice %8 {offsets = [0, 1], sizes = [16, 1], strides = [1, 1]} : vector<16x3xi32> to vector<16x1xi32>
    %c64_i32 = arith.constant 64 : i32
    %14 = vector.broadcast %c64_i32 : i32 to vector<16x1xi32>
    %15 = arith.addi %13, %14 : vector<16x1xi32>
    %16 = vector.broadcast %15 : vector<16x1xi32> to vector<16x256xi32>
    %17 = arith.cmpi eq, %9, %16 : vector<16x256xi32>
    %18 = arith.ori %12, %17 : vector<16x256xi1>
    %19 = vector.extract_strided_slice %8 {offsets = [0, 2], sizes = [16, 1], strides = [1, 1]} : vector<16x3xi32> to vector<16x1xi32>
    %c128_i32 = arith.constant 128 : i32
    %20 = vector.broadcast %c128_i32 : i32 to vector<16x1xi32>
    %21 = arith.addi %19, %20 : vector<16x1xi32>
    %22 = vector.broadcast %21 : vector<16x1xi32> to vector<16x256xi32>
    %23 = arith.cmpi eq, %9, %22 : vector<16x256xi32>
    %24 = arith.ori %18, %23 : vector<16x256xi1>
    %25 = arith.extui %24 : vector<16x256xi1> to vector<16x256xi32>
    %26 = arith.sitofp %25 : vector<16x256xi32> to vector<16x256xf32>
    %c0_1 = arith.constant 0 : index
    %c0_2 = arith.constant 0 : index
    %27 = vector.load %arg2[%c0_1, %c0_2] : memref<256x128xf32, #tpu.memory_space<vmem>>, vector<256x128xf32>
    %cst_3 = arith.constant dense<0.000000e+00> : vector<16x128xf32>
    %28 = tpu.matmul %26, %27, %cst_3 {dimension_numbers = #tpu.dot_dimension_numbers<[1], [0], [0], [1], [0, 0, 1, 1], [], []>} : vector<16x256xf32>, vector<256x128xf32>, vector<16x128xf32> -> vector<16x128xf32>
    %c0_4 = arith.constant 0 : index
    %c0_5 = arith.constant 0 : index
    %29 = vector.load %arg3[%c0_4, %c0_5] : memref<16x128xf32, #tpu.memory_space<vmem>>, vector<16x128xf32>
    tpu.vector_store %arg3[%c0_4, %c0_5], %28 {strides = array<i32>} : memref<16x128xf32, #tpu.memory_space<vmem>>, vector<16x128xf32>,
    return
  }
  func.func @transform_0(%arg0: i32) -> (i32, i32) {
    %c0_i32 = arith.constant 0 : i32
    %c0_i32_0 = arith.constant 0 : i32
    return %arg0, %c0_i32 : i32, i32
  }
  func.func @transform_1(%arg0: i32) -> (i32, i32) {
    %c0_i32 = arith.constant 0 : i32
    %c0_i32_0 = arith.constant 0 : i32
    %c0_i32_1 = arith.constant 0 : i32
    return %c0_i32, %c0_i32_0 : i32, i32
  }
  func.func @transform_2(%arg0: i32) -> (i32, i32) {
    %c0_i32 = arith.constant 0 : i32
    %c0_i32_0 = arith.constant 0 : i32
    return %arg0, %c0_i32 : i32, i32
  }
}

module attributes {stable_mosaic.version = 11 : i64} {
  func.func @spe_kernel(%arg0: i32, %arg1: memref<16x4xf32, #tpu.memory_space<vmem>>, %arg2: memref<256x128xf32, #tpu.memory_space<vmem>>, %arg3: memref<16x128xf32, #tpu.memory_space<vmem>>) attributes {dimension_semantics = [#tpu.dimension_semantics<parallel>], iteration_bounds = array<i64: 1>, scalar_prefetch = 0 : i64, scratch_operands = 0 : i64, tpu.core_type = #tpu.core_type<tc>, window_params = [{transform_indices = @transform_0, window_bounds = array<i64: 16, 4>}, {pipeline_mode = #tpu.pipeline_mode<synchronous>, transform_indices = @transform_1, window_bounds = array<i64: 256, 128>}, {transform_indices = @transform_2, window_bounds = array<i64: 16, 128>}]} {
    %c0 = arith.constant 0 : index
    %c0_0 = arith.constant 0 : index
    %0 = vector.load %arg1[%c0, %c0_0] : memref<16x4xf32, #tpu.memory_space<vmem>>, vector<16x4xf32>
    %1 = vector.extract_strided_slice %0 {offsets = [0, 1], sizes = [16, 3], strides = [1, 1]} : vector<16x4xf32> to vector<16x3xf32>
    %cst = arith.constant 3.200000e+01 : f32
    %2 = vector.broadcast %cst : f32 to vector<16x3xf32>
    %3 = arith.addf %1, %2 : vector<16x3xf32>
    %4 = arith.fptosi %3 : vector<16x3xf32> to vector<16x3xi32>
    %c0_i32 = arith.constant 0 : i32
    %c63_i32 = arith.constant 63 : i32
    %5 = vector.broadcast %c0_i32 : i32 to vector<16x3xi32>
    %6 = arith.maxsi %5, %4 : vector<16x3xi32>
    %7 = vector.broadcast %c63_i32 : i32 to vector<16x3xi32>
    %8 = arith.minsi %7, %6 : vector<16x3xi32>
    %9 = tpu.iota {dimensions = array<i32: 1>} : vector<16x256xi32>
    %10 = vector.extract_strided_slice %8 {offsets = [0, 0], sizes = [16, 1], strides = [1, 1]} : vector<16x3xi32> to vector<16x1xi32>
    %11 = vector.broadcast %10 : vector<16x1xi32> to vector<16x256xi32>
    %12 = arith.cmpi eq, %9, %11 : vector<16x256xi32>
    %13 = vector.extract_strided_slice %8 {offsets = [0, 1], sizes = [16, 1], strides = [1, 1]} : vector<16x3xi32> to vector<16x1xi32>
    %c64_i32 = arith.constant 64 : i32
    %14 = vector.broadcast %c64_i32 : i32 to vector<16x1xi32>
    %15 = arith.addi %13, %14 : vector<16x1xi32>
    %16 = vector.broadcast %15 : vector<16x1xi32> to vector<16x256xi32>
    %17 = arith.cmpi eq, %9, %16 : vector<16x256xi32>
    %18 = arith.ori %12, %17 : vector<16x256xi1>
    %19 = vector.extract_strided_slice %8 {offsets = [0, 2], sizes = [16, 1], strides = [1, 1]} : vector<16x3xi32> to vector<16x1xi32>
    %c128_i32 = arith.constant 128 : i32
    %20 = vector.broadcast %c128_i32 : i32 to vector<16x1xi32>
    %21 = arith.addi %19, %20 : vector<16x1xi32>
    %22 = vector.broadcast %21 : vector<16x1xi32> to vector<16x256xi32>
    %23 = arith.cmpi eq, %9, %22 : vector<16x256xi32>
    %24 = arith.ori %18, %23 : vector<16x256xi1>
    %25 = arith.extui %24 : vector<16x256xi1> to vector<16x256xi32>
    %26 = arith.sitofp %25 : vector<16x256xi32> to vector<16x256xf32>
    %c0_1 = arith.constant 0 : index
    %c0_2 = arith.constant 0 : index
    %27 = vector.load %arg2[%c0_1, %c0_2] : memref<256x128xf32, #tpu.memory_space<vmem>>, vector<256x128xf32>
    %cst_3 = arith.constant dense<0.000000e+00> : vector<16x128xf32>
    %28 = tpu.matmul %26, %27, %cst_3 {dimension_numbers = #tpu.dot_dimension_numbers<[1], [0], [0], [1], [0, 0, 1, 1], [], []>} : vector<16x256xf32>, vector<256x128xf32>, vector<16x128xf32> -> vector<16x128xf32>
    %c0_4 = arith.constant 0 : index
    %c0_5 = arith.constant 0 : index
    %29 = vector.load %arg3[%c0_4, %c0_5] : memref<16x128xf32, #tpu.memory_space<vmem>>, vector<16x128xf32>
    tpu.vector_store %arg3[%c0_4, %c0_5], %28 {strides = array<i32>} : memref<16x128xf32, #tpu.memory_space<vmem>>, vector<16x128xf32>,
    return
  }
  func.func @transform_0(%arg0: i32) -> (i32, i32) {
    %c0_i32 = arith.constant 0 : i32
    %c0_i32_0 = arith.constant 0 : i32
    return %arg0, %c0_i32 : i32, i32
  }
  func.func @transform_1(%arg0: i32) -> (i32, i32) {
    %c0_i32 = arith.constant 0 : i32
    %c0_i32_0 = arith.constant 0 : i32
    %c0_i32_1 = arith.constant 0 : i32
    return %c0_i32, %c0_i32_0 : i32, i32
  }
  func.func @transform_2(%arg0: i32) -> (i32, i32) {
    %c0_i32 = arith.constant 0 : i32
    %c0_i32_0 = arith.constant 0 : i32
    return %arg0, %c0_i32 : i32, i32
  }
}

</mosaic_0001>

<bundles_post_ra>
// kernel: tpu_custom_call.1
= control target key start
LH: loop header
LB: loop body
LE: loop exit
PB: predicated region body
PF: predicated region fallthrough
CT: control target
= control target key end

     0   :  { %7 = vsyncpa [#allocation3], 0  ;;  %s398_s0 = inlined_call_operand.vmem [shape: f32[16,4], index: 0, kind: input, shape index: {}]   ;;  %s399_s1 = inlined_call_operand.hbm [shape: f32[256,128], index: 1, kind: input, shape index: {}]   ;;  %s400_s2 = inlined_call_operand.hbm [shape: f32[16,128], index: 2, kind: output, shape index: {}]  }
   0x1   :  { %8 = vsyncpa [#allocation4], 0  ;;  %s357_s9 = smov [#allocation2]  }
   0x2   :  { %s16_s10 = sshll.u32 %s357_s9, 4  ;;  %s17_s10 = int_to_ptr.vmem [resolvable:$true] %s16_s10 }
   0x3   :  { %s321_s11 = scalar_lea.vmem %s17_s10, 4096  ;;  %p326_p1 = scmp.lt.s32.totalorder %s17_s10, %s17_s10 }
   0x4   :  { %p322_p0 = scmp.ne.s32.totalorder %s17_s10, %s321_s11  ;;  %p327_p2 = scmp.lt.s32.totalorder %s321_s11, %s321_s11 }
   0x6   :  { %p328_p3 = por %p327_p2, %p326_p1 }
   0x8   :  { %p329_p4 = pnand %p328_p3, %p322_p0 }
   0xa   :  { %332 = shalt.err (!%p329_p4)
}
   0xb   :  { %s358_s12 = smov 128   ;;  %s359_s13 = smov 8  }
   0xc   :  { %22 = dma.hbm_to_vmem [thread:$0]  %s399_s1, 4096, %s17_s10, [#allocation3], %s358_s12, %s358_s12, %s359_s13  }
   0xd   :  { %353 = dma.done.wait [#allocation3], 4096  }
   0xe   :  { %354 = vsyncadd [#allocation3], 4294963200  ;;  %v360_v0 = vmov 1   ;;  %v361_v1 = vmov 2   ;;  %v26_v2 = vld [vmem:[%s398_s0] sm:$0xff]  ;;  %v27_v3 = vld [vmem:[%s398_s0 + $0x8] sm:$0xff]  ;;  %v40_v51 = vlaneseq }
   0xf   :  { %309 = vset.pattern.permute.xlu0 %v360_v0  ;;  %310 = vset.pattern.permute.xlu1 %v361_v1  ;;  %v124_v4 = vld [vmem:[#allocation2 + $0xf8] sm:$0xff]  ;;  %v28_v5 = vadd.f32 32.0, %v26_v2  ;;  %v29_v6 = vadd.f32 32.0, %v27_v3  ;;  %v123_v8 = vld [vmem:[#allocation2 + $0xf0] sm:$0xff]  ;;  %v122_v10 = vld [vmem:[#allocation2 + $0xe8] sm:$0xff]  ;;  %v362_v36 = vmov 3  }
  0x10   :  { %227 = vmatprep.subr.mxu0 %v124_v4  ;;  %v108_v7 = vld [vmem:[#allocation2 + $0x78] sm:$0xff]  ;;  %265 = vmatprep.subr.mxu1 %v124_v4  ;;  %v107_v9 = vld [vmem:[#allocation2 + $0x70] sm:$0xff]  ;;  %v106_v13 = vld [vmem:[#allocation2 + $0x68] sm:$0xff]  ;;  %v41_v52 = vand.u32 127, %v40_v51  ;;  %v363_v60 = vmov 1.0   ;;  %s364_s0 = smov [#allocation5]  }
  0x11   :  { %228 = vmatpush3.msra.mxu0 %v108_v7  ;;  %281 = vmatpush3.msra.mxu1 %v108_v7  ;;  %v297_v11 = vtrunc.f32 %v28_v5  ;;  %v299_v12 = vtrunc.f32 %v29_v6  ;;  %v121_v14 = vld [vmem:[#allocation2 + $0xe0] sm:$0xff]  ;;  %v120_v18 = vld [vmem:[#allocation2 + $0xd8] sm:$0xff]  ;;  %v119_v22 = vld [vmem:[#allocation2 + $0xd0] sm:$0xff]  ;;  %s207_s1 = sshll.u32 %s364_s0, 4  ;;  %s208_s1 = int_to_ptr.vmem [resolvable:$true] %s207_s1 }
  0x12   :  { %229 = vmatprep.subr.mxu0 %v123_v8  ;;  %266 = vmatprep.subr.mxu1 %v123_v8  ;;  %v105_v17 = vld [vmem:[#allocation2 + $0x60] sm:$0xff]  ;;  %v104_v19 = vld [vmem:[#allocation2 + $0x58] sm:$0xff]  ;;  %v103_v23 = vld [vmem:[#allocation2 + $0x50] sm:$0xff]  ;;  %v42_v54 = vadd.s32 128, %v41_v52  ;;  %s333_s20 = scalar_lea.vmem %s208_s1, 256  ;;  %p338_p6 = scmp.lt.s32.totalorder %s208_s1, %s208_s1 }
  0x13   :  { %230 = vmatpush3.msra.mxu0 %v107_v9  ;;  %282 = vmatpush3.msra.mxu1 %v107_v9  ;;  %v298_v15 = vcvt.f32.s32 %v297_v11  ;;  %v300_v16 = vcvt.f32.s32 %v299_v12  ;;  %v118_v26 = vld [vmem:[#allocation2 + $0xc8] sm:$0xff]  ;;  %v117_v30 = vld [vmem:[#allocation2 + $0xc0] sm:$0xff]  ;;  %v116_v32 = vld [vmem:[#allocation2 + $0xb8] sm:$0xff]  ;;  %p334_p5 = scmp.ne.s32.totalorder %s208_s1, %s333_s20  ;;  %p339_p7 = scmp.lt.s32.totalorder %s333_s20, %s333_s20 }
  0x14   :  { %231 = vmatprep.subr.mxu0 %v122_v10  ;;  %267 = vmatprep.subr.mxu1 %v122_v10  ;;  %v102_v28 = vld [vmem:[#allocation2 + $0x48] sm:$0xff]  ;;  %v101_v31 = vld [vmem:[#allocation2 + $0x40] sm:$0xff]  ;;  %v100_v34 = vld [vmem:[#allocation2 + $0x38] sm:$0xff] }
  0x15   :  { %232 = vmatpush3.msra.mxu0 %v106_v13  ;;  %283 = vmatpush3.msra.mxu1 %v106_v13  ;;  %vm32_vm0 = vcmp.gt.s32.totalorder %v298_v15, 0  ;;  %vm34_vm1 = vcmp.gt.s32.totalorder %v300_v16, 0  ;;  %v115_v37 = vld [vmem:[#allocation2 + $0xb0] sm:$0xff]  ;;  %v114_v39 = vld [vmem:[#allocation2 + $0xa8] sm:$0xff]  ;;  %v113_v41 = vld [vmem:[#allocation2 + $0xa0] sm:$0xff]  ;;  %p340_p8 = por %p339_p7, %p338_p6 }
  0x16   :  { %233 = vmatprep.subr.mxu0 %v121_v14  ;;  %268 = vmatprep.subr.mxu1 %v121_v14  ;;  %v33_v20 = vsel %vm32_vm0, %v298_v15, 0  ;;  %v35_v21 = vsel %vm34_vm1, %v300_v16, 0  ;;  %v99_v38 = vld [vmem:[#allocation2 + $0x30] sm:$0xff]  ;;  %v98_v40 = vld [vmem:[#allocation2 + $0x28] sm:$0xff]  ;;  %v97_v42 = vld [vmem:[#allocation2 + $0x20] sm:$0xff] }
  0x17   :  { %234 = vmatpush3.msra.mxu0 %v105_v17  ;;  %284 = vmatpush3.msra.mxu1 %v105_v17  ;;  %vm36_vm2 = vcmp.lt.s32.totalorder %v33_v20, 63  ;;  %vm38_vm3 = vcmp.lt.s32.totalorder %v35_v21, 63  ;;  %v112_v43 = vld [vmem:[#allocation2 + $0x98] sm:$0xff]  ;;  %v111_v45 = vld [vmem:[#allocation2 + $0x90] sm:$0xff]  ;;  %v110_v47 = vld [vmem:[#allocation2 + $0x88] sm:$0xff]  ;;  %p341_p9 = pnand %p340_p8, %p334_p5 }
  0x18   :  { %235 = vmatprep.subr.mxu0 %v120_v18  ;;  %269 = vmatprep.subr.mxu1 %v120_v18  ;;  %v37_v24 = vsel %vm36_vm2, %v33_v20, 63  ;;  %v39_v25 = vsel %vm38_vm3, %v35_v21, 63  ;;  %v96_v44 = vld [vmem:[#allocation2 + $0x18] sm:$0xff]  ;;  %v95_v46 = vld [vmem:[#allocation2 + $0x10] sm:$0xff]  ;;  %v94_v48 = vld [vmem:[#allocation2 + $0x8] sm:$0xff] }
  0x19   :  { %236 = vmatpush3.msra.mxu0 %v104_v19  ;;  %285 = vmatpush3.msra.mxu1 %v104_v19  ;;  %v53_v27 = vadd.s32 64, %v37_v24  ;;  %v54_v29 = vadd.s32 64, %v39_v25  ;;  %v69_v33 = vadd.s32 128, %v37_v24  ;;  %v70_v35 = vadd.s32 128, %v39_v25  ;;  %v109_v49 = vld [vmem:[#allocation2 + $0x80] sm:$0xff] }
  0x1a   :  { %44 = vperm.xlu0 %309, %v37_v24   ;;  %237 = vmatprep.subr.mxu0 %v119_v22  ;;  %v93_v50 = vld [vmem:[#allocation2] sm:$0xff] }
  0x1b   :  { %238 = vmatpush3.msra.mxu0 %v103_v23  ;;  %270 = vmatprep.subr.mxu1 %v119_v22 }
  0x1c   :  { %56 = vperm.xlu1 %310, %v53_v27   ;;  %239 = vmatprep.subr.mxu0 %v118_v26 }
  0x1d   :  { %286 = vmatpush3.msra.mxu1 %v103_v23  ;;  %240 = vmatpush3.msra.mxu0 %v102_v28 }
  0x1e   :  { %47 = vperm.xlu0 %309, %v39_v25   ;;  %271 = vmatprep.subr.mxu1 %v118_v26 }
  0x1f   :  { %241 = vmatprep.subr.mxu0 %v117_v30  ;;  %287 = vmatpush3.msra.mxu1 %v102_v28 }
  0x20   :  { %59 = vperm.xlu1 %310, %v54_v29   ;;  %242 = vmatpush3.msra.mxu0 %v101_v31 }
  0x21   :  { %272 = vmatprep.subr.mxu1 %v117_v30  ;;  %243 = vmatprep.subr.mxu0 %v116_v32 }
  0x22   :  { %311 = vset.pattern.permute.xlu0 %v362_v36  ;;  %288 = vmatpush3.msra.mxu1 %v101_v31 }
  0x23   :  { %72 = vperm.xlu0 %311, %v69_v33   ;;  %244 = vmatpush3.msra.mxu0 %v100_v34 }
  0x24   :  { %312 = vset.pattern.permute.xlu1 %v362_v36  ;;  %273 = vmatprep.subr.mxu1 %v116_v32 }
  0x25   :  { %75 = vperm.xlu1 %312, %v70_v35   ;;  %245 = vmatprep.subr.mxu0 %v115_v37 }
  0x26   :  { %289 = vmatpush3.msra.mxu1 %v100_v34  ;;  %246 = vmatpush3.msra.mxu0 %v99_v38 }
  0x27   :  { %274 = vmatprep.subr.mxu1 %v115_v37  ;;  %247 = vmatprep.subr.mxu0 %v114_v39 }
  0x28   :  { %290 = vmatpush3.msra.mxu1 %v99_v38  ;;  %248 = vmatpush3.msra.mxu0 %v98_v40 }
  0x29   :  { %275 = vmatprep.subr.mxu1 %v114_v39  ;;  %249 = vmatprep.subr.mxu0 %v113_v41 }
  0x2a   :  { %291 = vmatpush3.msra.mxu1 %v98_v40  ;;  %250 = vmatpush3.msra.mxu0 %v97_v42 }
  0x2b   :  { %276 = vmatprep.subr.mxu1 %v113_v41  ;;  %251 = vmatprep.subr.mxu0 %v112_v43 }
  0x2c   :  { %292 = vmatpush3.msra.mxu1 %v97_v42  ;;  %252 = vmatpush3.msra.mxu0 %v96_v44 }
  0x2d   :  { %277 = vmatprep.subr.mxu1 %v112_v43  ;;  %253 = vmatprep.subr.mxu0 %v111_v45 }
  0x2e   :  { %293 = vmatpush3.msra.mxu1 %v96_v44  ;;  %254 = vmatpush3.msra.mxu0 %v95_v46 }
  0x2f   :  { %278 = vmatprep.subr.mxu1 %v111_v45  ;;  %255 = vmatprep.subr.mxu0 %v110_v47 }
  0x30   :  { %294 = vmatpush3.msra.mxu1 %v95_v46  ;;  %256 = vmatpush3.msra.mxu0 %v94_v48 }
  0x31   :  { %279 = vmatprep.subr.mxu1 %v110_v47  ;;  %257 = vmatprep.subr.mxu0 %v109_v49 }
  0x32   :  { %295 = vmatpush3.msra.mxu1 %v94_v48  ;;  %258 = vmatpush3.msra.mxu0 %v93_v50 }
  0x33   :  { %280 = vmatprep.subr.mxu1 %v109_v49 }
  0x34   :  { %296 = vmatpush3.msra.mxu1 %v93_v50 }
  0x95   :  { %v45_v53 = vpop.permute.xlu0 %44 }
  0x96   :  { %vm49_vm4 = vcmp.eq.s32.totalorder %v41_v52, %v45_v53  ;;  %vm50_vm6 = vcmp.eq.s32.totalorder %v42_v54, %v45_v53 }
  0x97   :  { %v57_v55 = vpop.permute.xlu1 %56 }
  0x98   :  { %vm61_vm5 = vcmp.eq.s32.totalorder %v41_v52, %v57_v55  ;;  %vm62_vm7 = vcmp.eq.s32.totalorder %v42_v54, %v57_v55 }
  0x99   :  { %v48_v56 = vpop.permute.xlu0 %47  ;;  %vm65_vm10 = vmor %vm49_vm4, %vm61_vm5 }
  0x9a   :  { %vm51_vm11 = vcmp.eq.s32.totalorder %v41_v52, %v48_v56  ;;  %vm66_vm12 = vmor %vm50_vm6, %vm62_vm7  ;;  %vm52_vm13 = vcmp.eq.s32.totalorder %v42_v54, %v48_v56 }
  0x9b   :  { %v60_v57 = vpop.permute.xlu1 %59 }
  0x9c   :  { %vm63_vm8 = vcmp.eq.s32.totalorder %v41_v52, %v60_v57  ;;  %vm64_vm9 = vcmp.eq.s32.totalorder %v42_v54, %v60_v57 }
  0x9d   :  { %vm67_vm14 = vmor %vm51_vm11, %vm63_vm8 }
  0x9e   :  { %v73_v58 = vpop.permute.xlu0 %72  ;;  %vm68_vm1 = vmor %vm52_vm13, %vm64_vm9 }
  0x9f   :  { %vm77_vm15 = vcmp.eq.s32.totalorder %v41_v52, %v73_v58  ;;  %vm78_vm0 = vcmp.eq.s32.totalorder %v42_v54, %v73_v58 }
  0xa0   :  { %vm81_vm2 = vmor %vm65_vm10, %vm77_vm15  ;;  %v76_v59 = vpop.permute.xlu1 %75 }
  0xa1   :  { %vm79_vm3 = vcmp.eq.s32.totalorder %v41_v52, %v76_v59  ;;  %vm80_vm4 = vcmp.eq.s32.totalorder %v42_v54, %v76_v59  ;;  %vm82_vm5 = vmor %vm66_vm12, %vm78_vm0 }
  0xa2   :  { %vm83_vm6 = vmor %vm67_vm14, %vm79_vm3  ;;  %223 = vmatprep.mubr.msk.f32.mxu0 %vm82_vm5, %v363_v60 }
  0xa3   :  { %224 = vmatmul.mubr.msk.f32.vlgmr.msra.gmra.mxu0 %vm81_vm2, %v363_v60  ;;  %vm84_vm7 = vmor %vm68_vm1, %vm80_vm4 }
  0xa4   :  { %225 = vmatprep.mubr.msk.f32.mxu1 %vm84_vm7, %v363_v60 }
  0xa5   :  { %226 = vmatmul.mubr.msk.f32.vlgmr.msra.gmra.mxu1 %vm83_vm6, %v363_v60 }
 0x163   :  { %v259_v61 = vpop.f32.mrf.mxu0 }
 0x165   :  { %v260_v62 = vpop.f32.mrf.mxu0  ;;  %v262_v63 = vpop.f32.mrf.mxu1 }
 0x166   :  { %v261_v0 = vadd.f32 %v260_v62, %v259_v61 }
 0x167   :  { %v263_v1 = vpop.f32.mrf.mxu1 }
 0x168   :  { %200 = vst [vmem:[#allocation5] sm:$0xff] %v261_v0  ;;  %v264_v2 = vadd.f32 %v263_v1, %v262_v63 }
 0x16a   :  { %201 = vst [vmem:[#allocation5 + $0x8] sm:$0xff] %v264_v2 }
 0x16b   :  { %344 = shalt.err (!%p341_p9)
}
 0x16c   :  { %213 = dma.vmem_to_hbm [thread:$0]  %s208_s1, 256, %s400_s2, [#allocation4], %s358_s12, %s358_s12, %s359_s13  }
 0x16d   :  { %355 = dma.done.wait [#allocation4], 256  }
 0x16e   :  { %356 = vsyncadd [#allocation4], 4294967040 }
 0x16f   :  { %217 = vsyncpa [#allocation3], 1 }
 0x170   :  { %218 = vsyncpa [#allocation4], 1 }

// kernel: tpu_custom_call.1
= control target key start
LH: loop header
LB: loop body
LE: loop exit
PB: predicated region body
PF: predicated region fallthrough
CT: control target
= control target key end

     0   :  { %7 = vsyncpa [#allocation3], 0  ;;  %s398_s0 = inlined_call_operand.vmem [shape: f32[16,4], index: 0, kind: input, shape index: {}]   ;;  %s399_s1 = inlined_call_operand.hbm [shape: f32[256,128], index: 1, kind: input, shape index: {}]   ;;  %s400_s2 = inlined_call_operand.hbm [shape: f32[16,128], index: 2, kind: output, shape index: {}]  }
   0x1   :  { %8 = vsyncpa [#allocation4], 0  ;;  %s357_s9 = smov [#allocation2]  }
   0x2   :  { %s16_s10 = sshll.u32 %s357_s9, 4  ;;  %s17_s10 = int_to_ptr.vmem [resolvable:$true] %s16_s10 }
   0x3   :  { %s321_s11 = scalar_lea.vmem %s17_s10, 4096  ;;  %p326_p1 = scmp.lt.s32.totalorder %s17_s10, %s17_s10 }
   0x4   :  { %p322_p0 = scmp.ne.s32.totalorder %s17_s10, %s321_s11  ;;  %p327_p2 = scmp.lt.s32.totalorder %s321_s11, %s321_s11 }
   0x6   :  { %p328_p3 = por %p327_p2, %p326_p1 }
   0x8   :  { %p329_p4 = pnand %p328_p3, %p322_p0 }
   0xa   :  { %332 = shalt.err (!%p329_p4)
}
   0xb   :  { %s358_s12 = smov 128   ;;  %s359_s13 = smov 8  }
   0xc   :  { %22 = dma.hbm_to_vmem [thread:$0]  %s399_s1, 4096, %s17_s10, [#allocation3], %s358_s12, %s358_s12, %s359_s13  }
   0xd   :  { %353 = dma.done.wait [#allocation3], 4096  }
   0xe   :  { %354 = vsyncadd [#allocation3], 4294963200  ;;  %v360_v0 = vmov 1   ;;  %v361_v1 = vmov 2   ;;  %v26_v2 = vld [vmem:[%s398_s0] sm:$0xff]  ;;  %v27_v3 = vld [vmem:[%s398_s0 + $0x8] sm:$0xff]  ;;  %v40_v51 = vlaneseq }
   0xf   :  { %309 = vset.pattern.permute.xlu0 %v360_v0  ;;  %310 = vset.pattern.permute.xlu1 %v361_v1  ;;  %v124_v4 = vld [vmem:[#allocation2 + $0xf8] sm:$0xff]  ;;  %v28_v5 = vadd.f32 32.0, %v26_v2  ;;  %v29_v6 = vadd.f32 32.0, %v27_v3  ;;  %v123_v8 = vld [vmem:[#allocation2 + $0xf0] sm:$0xff]  ;;  %v122_v10 = vld [vmem:[#allocation2 + $0xe8] sm:$0xff]  ;;  %v362_v36 = vmov 3  }
  0x10   :  { %227 = vmatprep.subr.mxu0 %v124_v4  ;;  %v108_v7 = vld [vmem:[#allocation2 + $0x78] sm:$0xff]  ;;  %265 = vmatprep.subr.mxu1 %v124_v4  ;;  %v107_v9 = vld [vmem:[#allocation2 + $0x70] sm:$0xff]  ;;  %v106_v13 = vld [vmem:[#allocation2 + $0x68] sm:$0xff]  ;;  %v41_v52 = vand.u32 127, %v40_v51  ;;  %v363_v60 = vmov 1.0   ;;  %s364_s0 = smov [#allocation5]  }
  0x11   :  { %228 = vmatpush3.msra.mxu0 %v108_v7  ;;  %281 = vmatpush3.msra.mxu1 %v108_v7  ;;  %v297_v11 = vtrunc.f32 %v28_v5  ;;  %v299_v12 = vtrunc.f32 %v29_v6  ;;  %v121_v14 = vld [vmem:[#allocation2 + $0xe0] sm:$0xff]  ;;  %v120_v18 = vld [vmem:[#allocation2 + $0xd8] sm:$0xff]  ;;  %v119_v22 = vld [vmem:[#allocation2 + $0xd0] sm:$0xff]  ;;  %s207_s1 = sshll.u32 %s364_s0, 4  ;;  %s208_s1 = int_to_ptr.vmem [resolvable:$true] %s207_s1 }
  0x12   :  { %229 = vmatprep.subr.mxu0 %v123_v8  ;;  %266 = vmatprep.subr.mxu1 %v123_v8  ;;  %v105_v17 = vld [vmem:[#allocation2 + $0x60] sm:$0xff]  ;;  %v104_v19 = vld [vmem:[#allocation2 + $0x58] sm:$0xff]  ;;  %v103_v23 = vld [vmem:[#allocation2 + $0x50] sm:$0xff]  ;;  %v42_v54 = vadd.s32 128, %v41_v52  ;;  %s333_s20 = scalar_lea.vmem %s208_s1, 256  ;;  %p338_p6 = scmp.lt.s32.totalorder %s208_s1, %s208_s1 }
  0x13   :  { %230 = vmatpush3.msra.mxu0 %v107_v9  ;;  %282 = vmatpush3.msra.mxu1 %v107_v9  ;;  %v298_v15 = vcvt.f32.s32 %v297_v11  ;;  %v300_v16 = vcvt.f32.s32 %v299_v12  ;;  %v118_v26 = vld [vmem:[#allocation2 + $0xc8] sm:$0xff]  ;;  %v117_v30 = vld [vmem:[#allocation2 + $0xc0] sm:$0xff]  ;;  %v116_v32 = vld [vmem:[#allocation2 + $0xb8] sm:$0xff]  ;;  %p334_p5 = scmp.ne.s32.totalorder %s208_s1, %s333_s20  ;;  %p339_p7 = scmp.lt.s32.totalorder %s333_s20, %s333_s20 }
  0x14   :  { %231 = vmatprep.subr.mxu0 %v122_v10  ;;  %267 = vmatprep.subr.mxu1 %v122_v10  ;;  %v102_v28 = vld [vmem:[#allocation2 + $0x48] sm:$0xff]  ;;  %v101_v31 = vld [vmem:[#allocation2 + $0x40] sm:$0xff]  ;;  %v100_v34 = vld [vmem:[#allocation2 + $0x38] sm:$0xff] }
  0x15   :  { %232 = vmatpush3.msra.mxu0 %v106_v13  ;;  %283 = vmatpush3.msra.mxu1 %v106_v13  ;;  %vm32_vm0 = vcmp.gt.s32.totalorder %v298_v15, 0  ;;  %vm34_vm1 = vcmp.gt.s32.totalorder %v300_v16, 0  ;;  %v115_v37 = vld [vmem:[#allocation2 + $0xb0] sm:$0xff]  ;;  %v114_v39 = vld [vmem:[#allocation2 + $0xa8] sm:$0xff]  ;;  %v113_v41 = vld [vmem:[#allocation2 + $0xa0] sm:$0xff]  ;;  %p340_p8 = por %p339_p7, %p338_p6 }
  0x16   :  { %233 = vmatprep.subr.mxu0 %v121_v14  ;;  %268 = vmatprep.subr.mxu1 %v121_v14  ;;  %v33_v20 = vsel %vm32_vm0, %v298_v15, 0  ;;  %v35_v21 = vsel %vm34_vm1, %v300_v16, 0  ;;  %v99_v38 = vld [vmem:[#allocation2 + $0x30] sm:$0xff]  ;;  %v98_v40 = vld [vmem:[#allocation2 + $0x28] sm:$0xff]  ;;  %v97_v42 = vld [vmem:[#allocation2 + $0x20] sm:$0xff] }
  0x17   :  { %234 = vmatpush3.msra.mxu0 %v105_v17  ;;  %284 = vmatpush3.msra.mxu1 %v105_v17  ;;  %vm36_vm2 = vcmp.lt.s32.totalorder %v33_v20, 63  ;;  %vm38_vm3 = vcmp.lt.s32.totalorder %v35_v21, 63  ;;  %v112_v43 = vld [vmem:[#allocation2 + $0x98] sm:$0xff]  ;;  %v111_v45 = vld [vmem:[#allocation2 + $0x90] sm:$0xff]  ;;  %v110_v47 = vld [vmem:[#allocation2 + $0x88] sm:$0xff]  ;;  %p341_p9 = pnand %p340_p8, %p334_p5 }
  0x18   :  { %235 = vmatprep.subr.mxu0 %v120_v18  ;;  %269 = vmatprep.subr.mxu1 %v120_v18  ;;  %v37_v24 = vsel %vm36_vm2, %v33_v20, 63  ;;  %v39_v25 = vsel %vm38_vm3, %v35_v21, 63  ;;  %v96_v44 = vld [vmem:[#allocation2 + $0x18] sm:$0xff]  ;;  %v95_v46 = vld [vmem:[#allocation2 + $0x10] sm:$0xff]  ;;  %v94_v48 = vld [vmem:[#allocation2 + $0x8] sm:$0xff] }
  0x19   :  { %236 = vmatpush3.msra.mxu0 %v104_v19  ;;  %285 = vmatpush3.msra.mxu1 %v104_v19  ;;  %v53_v27 = vadd.s32 64, %v37_v24  ;;  %v54_v29 = vadd.s32 64, %v39_v25  ;;  %v69_v33 = vadd.s32 128, %v37_v24  ;;  %v70_v35 = vadd.s32 128, %v39_v25  ;;  %v109_v49 = vld [vmem:[#allocation2 + $0x80] sm:$0xff] }
  0x1a   :  { %44 = vperm.xlu0 %309, %v37_v24   ;;  %237 = vmatprep.subr.mxu0 %v119_v22  ;;  %v93_v50 = vld [vmem:[#allocation2] sm:$0xff] }
  0x1b   :  { %238 = vmatpush3.msra.mxu0 %v103_v23  ;;  %270 = vmatprep.subr.mxu1 %v119_v22 }
  0x1c   :  { %56 = vperm.xlu1 %310, %v53_v27   ;;  %239 = vmatprep.subr.mxu0 %v118_v26 }
  0x1d   :  { %286 = vmatpush3.msra.mxu1 %v103_v23  ;;  %240 = vmatpush3.msra.mxu0 %v102_v28 }
  0x1e   :  { %47 = vperm.xlu0 %309, %v39_v25   ;;  %271 = vmatprep.subr.mxu1 %v118_v26 }
  0x1f   :  { %241 = vmatprep.subr.mxu0 %v117_v30  ;;  %287 = vmatpush3.msra.mxu1 %v102_v28 }
  0x20   :  { %59 = vperm.xlu1 %310, %v54_v29   ;;  %242 = vmatpush3.msra.mxu0 %v101_v31 }
  0x21   :  { %272 = vmatprep.subr.mxu1 %v117_v30  ;;  %243 = vmatprep.subr.mxu0 %v116_v32 }
  0x22   :  { %311 = vset.pattern.permute.xlu0 %v362_v36  ;;  %288 = vmatpush3.msra.mxu1 %v101_v31 }
  0x23   :  { %72 = vperm.xlu0 %311, %v69_v33   ;;  %244 = vmatpush3.msra.mxu0 %v100_v34 }
  0x24   :  { %312 = vset.pattern.permute.xlu1 %v362_v36  ;;  %273 = vmatprep.subr.mxu1 %v116_v32 }
  0x25   :  { %75 = vperm.xlu1 %312, %v70_v35   ;;  %245 = vmatprep.subr.mxu0 %v115_v37 }
  0x26   :  { %289 = vmatpush3.msra.mxu1 %v100_v34  ;;  %246 = vmatpush3.msra.mxu0 %v99_v38 }
  0x27   :  { %274 = vmatprep.subr.mxu1 %v115_v37  ;;  %247 = vmatprep.subr.mxu0 %v114_v39 }
  0x28   :  { %290 = vmatpush3.msra.mxu1 %v99_v38  ;;  %248 = vmatpush3.msra.mxu0 %v98_v40 }
  0x29   :  { %275 = vmatprep.subr.mxu1 %v114_v39  ;;  %249 = vmatprep.subr.mxu0 %v113_v41 }
  0x2a   :  { %291 = vmatpush3.msra.mxu1 %v98_v40  ;;  %250 = vmatpush3.msra.mxu0 %v97_v42 }
  0x2b   :  { %276 = vmatprep.subr.mxu1 %v113_v41  ;;  %251 = vmatprep.subr.mxu0 %v112_v43 }
  0x2c   :  { %292 = vmatpush3.msra.mxu1 %v97_v42  ;;  %252 = vmatpush3.msra.mxu0 %v96_v44 }
  0x2d   :  { %277 = vmatprep.subr.mxu1 %v112_v43  ;;  %253 = vmatprep.subr.mxu0 %v111_v45 }
  0x2e   :  { %293 = vmatpush3.msra.mxu1 %v96_v44  ;;  %254 = vmatpush3.msra.mxu0 %v95_v46 }
  0x2f   :  { %278 = vmatprep.subr.mxu1 %v111_v45  ;;  %255 = vmatprep.subr.mxu0 %v110_v47 }
  0x30   :  { %294 = vmatpush3.msra.mxu1 %v95_v46  ;;  %256 = vmatpush3.msra.mxu0 %v94_v48 }
  0x31   :  { %279 = vmatprep.subr.mxu1 %v110_v47  ;;  %257 = vmatprep.subr.mxu0 %v109_v49 }
  0x32   :  { %295 = vmatpush3.msra.mxu1 %v94_v48  ;;  %258 = vmatpush3.msra.mxu0 %v93_v50 }
  0x33   :  { %280 = vmatprep.subr.mxu1 %v109_v49 }
  0x34   :  { %296 = vmatpush3.msra.mxu1 %v93_v50 }
  0x95   :  { %v45_v53 = vpop.permute.xlu0 %44 }
  0x96   :  { %vm49_vm4 = vcmp.eq.s32.totalorder %v41_v52, %v45_v53  ;;  %vm50_vm6 = vcmp.eq.s32.totalorder %v42_v54, %v45_v53 }
  0x97   :  { %v57_v55 = vpop.permute.xlu1 %56 }
  0x98   :  { %vm61_vm5 = vcmp.eq.s32.totalorder %v41_v52, %v57_v55  ;;  %vm62_vm7 = vcmp.eq.s32.totalorder %v42_v54, %v57_v55 }
  0x99   :  { %v48_v56 = vpop.permute.xlu0 %47  ;;  %vm65_vm10 = vmor %vm49_vm4, %vm61_vm5 }
  0x9a   :  { %vm51_vm11 = vcmp.eq.s32.totalorder %v41_v52, %v48_v56  ;;  %vm66_vm12 = vmor %vm50_vm6, %vm62_vm7  ;;  %vm52_vm13 = vcmp.eq.s32.totalorder %v42_v54, %v48_v56 }
  0x9b   :  { %v60_v57 = vpop.permute.xlu1 %59 }
  0x9c   :  { %vm63_vm8 = vcmp.eq.s32.totalorder %v41_v52, %v60_v57  ;;  %vm64_vm9 = vcmp.eq.s32.totalorder %v42_v54, %v60_v57 }
  0x9d   :  { %vm67_vm14 = vmor %vm51_vm11, %vm63_vm8 }
  0x9e   :  { %v73_v58 = vpop.permute.xlu0 %72  ;;  %vm68_vm1 = vmor %vm52_vm13, %vm64_vm9 }
  0x9f   :  { %vm77_vm15 = vcmp.eq.s32.totalorder %v41_v52, %v73_v58  ;;  %vm78_vm0 = vcmp.eq.s32.totalorder %v42_v54, %v73_v58 }
  0xa0   :  { %vm81_vm2 = vmor %vm65_vm10, %vm77_vm15  ;;  %v76_v59 = vpop.permute.xlu1 %75 }
  0xa1   :  { %vm79_vm3 = vcmp.eq.s32.totalorder %v41_v52, %v76_v59  ;;  %vm80_vm4 = vcmp.eq.s32.totalorder %v42_v54, %v76_v59  ;;  %vm82_vm5 = vmor %vm66_vm12, %vm78_vm0 }
  0xa2   :  { %vm83_vm6 = vmor %vm67_vm14, %vm79_vm3  ;;  %223 = vmatprep.mubr.msk.f32.mxu0 %vm82_vm5, %v363_v60 }
  0xa3   :  { %224 = vmatmul.mubr.msk.f32.vlgmr.msra.gmra.mxu0 %vm81_vm2, %v363_v60  ;;  %vm84_vm7 = vmor %vm68_vm1, %vm80_vm4 }
  0xa4   :  { %225 = vmatprep.mubr.msk.f32.mxu1 %vm84_vm7, %v363_v60 }
  0xa5   :  { %226 = vmatmul.mubr.msk.f32.vlgmr.msra.gmra.mxu1 %vm83_vm6, %v363_v60 }
 0x163   :  { %v259_v61 = vpop.f32.mrf.mxu0 }
 0x165   :  { %v260_v62 = vpop.f32.mrf.mxu0  ;;  %v262_v63 = vpop.f32.mrf.mxu1 }
 0x166   :  { %v261_v0 = vadd.f32 %v260_v62, %v259_v61 }
 0x167   :  { %v263_v1 = vpop.f32.mrf.mxu1 }
 0x168   :  { %200 = vst [vmem:[#allocation5] sm:$0xff] %v261_v0  ;;  %v264_v2 = vadd.f32 %v263_v1, %v262_v63 }
 0x16a   :  { %201 = vst [vmem:[#allocation5 + $0x8] sm:$0xff] %v264_v2 }
 0x16b   :  { %344 = shalt.err (!%p341_p9)
}
 0x16c   :  { %213 = dma.vmem_to_hbm [thread:$0]  %s208_s1, 256, %s400_s2, [#allocation4], %s358_s12, %s358_s12, %s359_s13  }
 0x16d   :  { %355 = dma.done.wait [#allocation4], 256  }
 0x16e   :  { %356 = vsyncadd [#allocation4], 4294967040 }
 0x16f   :  { %217 = vsyncpa [#allocation3], 1 }
 0x170   :  { %218 = vsyncpa [#allocation4], 1 }

</bundles_post_ra>
